<compile_context>
chip_gen: v6e
topology: v6e:2x2x1
jax: 0.10.0
libtpu: 0.0.40
codegen_flags: <defaults>
</compile_context>

<pallas_src>
import jax
import jax.numpy as jnp
from jax import lax
from jax.experimental import pallas as pl
from jax.experimental.pallas import tpu as pltpu


# ----------------------------- Pallas kernel ------------------------------- #
def convtranspose_kernel(x_ref, w_ref, b_ref, o_ref):
    """One (batch, row-tile) step of fused ConvTranspose2d(k=2,s=2,p=0)+BN+SiLU.

    x_ref: (1, TH*W, C1)        bf16  input tile, rows = (i, j), channels on lanes
    w_ref: (2, C1, 2*C2)        bf16  folded weight, w[kh, ci, kw*C2 + co]
    b_ref: (1, 2*C2)            f32   folded bias tiled over kw
    o_ref: (1, TH, 2, W, 2*C2)  f32   output tile; axis 2 = kh, last axis = (kw, co)
    """
    _, TH, _, W, two_c2 = o_ref.shape

    x2 = x_ref[0]                               # (TH*W, C1) -- already matmul-shaped
    b = b_ref[...]                              # (1, 2*C2) f32, hoisted out of tap loop

    for kh in range(2):                         # static 2-iteration unroll
        # MXU: bf16 x bf16 -> f32 accumulate, N fused over the two kw taps.
        acc = jnp.dot(x2, w_ref[kh], preferred_element_type=jnp.float32)
        y = acc + b                             # f32 epilogue (VPU)
        y = y * jax.nn.sigmoid(y)               # SiLU (EUP sigmoid, VPU mul)
        o_ref[0, :, kh, :, :] = y.reshape(TH, W, two_c2).astype(o_ref.dtype)


# ------------------------------- wrapper ----------------------------------- #
def convtranspose_forward(x_nchw, w_kh, b2, *, vmem_budget_bytes=8 << 20):
    """y = SiLU(BN(ConvTranspose2d(x))) with BN folded into (w_kh, b2).

    x_nchw: (N, C1, H, W) f32
    w_kh:   (2, C1, 2*C2) folded weight (cast to bf16 here)
    b2:     (2*C2,)       folded bias (kept f32)
    returns (N, C2, 2H, 2W) f32
    """
    N, C1, H, W = x_nchw.shape
    two_c2 = w_kh.shape[-1]
    C2 = two_c2 // 2

    # Glue: NCHW -> NHWC (channels on lanes), bf16 for the MXU path, rows flattened
    # so the kernel's matmul LHS needs no in-kernel reshape.  Both XLA ops fuse into
    # one HBM pass.
    x_rows = jnp.transpose(x_nchw, (0, 2, 3, 1)).astype(jnp.bfloat16).reshape(N, H * W, C1)
    w_bf16 = w_kh.astype(jnp.bfloat16)
    b_row = b2.reshape(1, two_c2).astype(jnp.float32)

    # Row tiling (no halo needed: each input row produces its own 2 output rows).
    # Pick the largest divisor of H whose double-buffered in+out footprint fits the
    # budget AND whose flattened row count respects the (8, 128) sublane rule.
    th = 1
    for cand in range(1, H + 1):
        if H % cand:
            continue
        if cand != H and (cand * W) % 8 != 0:
            continue
        in_bytes = cand * W * C1 * 2                     # bf16 input tile
        out_bytes = cand * 2 * W * two_c2 * 4            # f32 output tile
        if 2 * (in_bytes + out_bytes) <= vmem_budget_bytes:
            th = cand
    grid = (N, H // th)
    # TODO(synk): for very wide images (W*C too large for even th=1) add a W-tile axis.

    cost = pl.CostEstimate(
        flops=8 * N * H * W * C1 * C2,
        transcendentals=4 * N * H * W * C2,
        bytes_accessed=(x_rows.size * 2 + w_bf16.size * 2 + b_row.size * 4
                        + N * H * 2 * W * two_c2 * 4),
    )

    out = pl.pallas_call(
        convtranspose_kernel,
        out_shape=jax.ShapeDtypeStruct((N, H, 2, W, two_c2), jnp.float32),
        grid=grid,
        in_specs=[
            pl.BlockSpec((1, th * W, C1), lambda n, t: (n, t, 0)),
            pl.BlockSpec((2, C1, two_c2), lambda n, t: (0, 0, 0)),
            pl.BlockSpec((1, two_c2), lambda n, t: (0, 0)),
        ],
        out_specs=pl.BlockSpec((1, th, 2, W, two_c2),
                               lambda n, t: (n, t, 0, 0, 0)),
        compiler_params=pltpu.CompilerParams(
            dimension_semantics=("parallel", "parallel"),
            vmem_limit_bytes=32 * 1024 * 1024),
        cost_estimate=cost,
    )(x_rows, w_bf16, b_row)

    # (N, H, 2, W, 2*C2) has the same flat layout as NHWC (N, 2H, 2W, C2):
    # the de-interleave is a pure, free reshape.
    out_nhwc = out.reshape(N, 2 * H, 2 * W, C2)
    return jnp.transpose(out_nhwc, (0, 3, 1, 2))        # back to PyTorch NCHW


# ------------------------- parameter setup (glue) --------------------------- #
def fold_bn_into_convtranspose(w_iohw, gamma, beta, rmean, rvar, eps=1e-5):
    """Fold eval-mode BatchNorm2d into ConvTranspose2d weights.

    PyTorch ConvTranspose2d weight layout is (C1, C2, kH, kW); output channel = dim 1.
    """
    std = jnp.sqrt(rvar + eps)
    scale = gamma / std                                  # (C2,)
    w_f = w_iohw * scale[None, :, None, None]
    b_f = beta - rmean * scale
    return w_f, b_f


def pack_weights(w_f, b_f):
    """(C1, C2, 2, 2) -> (2, C1, 2*C2) with column order (kw, co); bias -> (2*C2,)."""
    C1, C2 = w_f.shape[0], w_f.shape[1]
    w_kh = jnp.transpose(w_f, (2, 0, 3, 1)).reshape(2, C1, 2 * C2)  # [kh, ci, kw*C2+co]
    b2 = jnp.tile(b_f, 2)                                           # [kw*C2+co] -> b_f[co]
    return w_kh, b2


# --------------------------------- main ------------------------------------ #
if __name__ == "__main__":
    N, C1, C2, H, W = 2, 4, 8, 16, 16
    key = jax.random.PRNGKey(0)
    kx, kwt, kg, kb, km, kv = jax.random.split(key, 6)

    x = jax.random.normal(kx, (N, C1, H, W), jnp.float32)
    # ConvTranspose2d(c1, c2, k=2, s=2, p=0, bias=False): weight (C1, C2, 2, 2).
    w = jax.random.normal(kwt, (C1, C2, 2, 2), jnp.float32) * 0.1
    # BatchNorm2d(c2) eval-mode parameters / running statistics.
    gamma = 1.0 + 0.1 * jax.random.normal(kg, (C2,), jnp.float32)
    beta = 0.1 * jax.random.normal(kb, (C2,), jnp.float32)
    rmean = 0.1 * jax.random.normal(km, (C2,), jnp.float32)
    rvar = jnp.abs(jax.random.normal(kv, (C2,), jnp.float32)) + 0.5

    w_f, b_f = fold_bn_into_convtranspose(w, gamma, beta, rmean, rvar)
    w_kh, b2 = pack_weights(w_f, b_f)

    y = convtranspose_forward(x, w_kh, b2)
    y = jax.block_until_ready(y)

    # Pure-JAX reference of the UNFUSED module: ConvTranspose2d -> BN(eval) -> SiLU.
    # ConvTranspose2d(k=2,s=2,p=0) == conv with lhs_dilation=2, pad=k-1-p=1 and the
    # spatially flipped kernel in OIHW layout.
    w_oihw_flip = jnp.transpose(w, (1, 0, 2, 3))[:, :, ::-1, ::-1]
    y_ct = lax.conv_general_dilated(
        x, w_oihw_flip, window_strides=(1, 1), padding=((1, 1), (1, 1)),
        lhs_dilation=(2, 2), dimension_numbers=("NCHW", "OIHW", "NCHW"))
    eps = 1e-5
    y_bn = ((y_ct - rmean.reshape(1, C2, 1, 1))
            / jnp.sqrt(rvar.reshape(1, C2, 1, 1) + eps)
            * gamma.reshape(1, C2, 1, 1) + beta.reshape(1, C2, 1, 1))
    y_ref = y_bn * jax.nn.sigmoid(y_bn)

    assert y.shape == y_ref.shape == (N, C2, 2 * H, 2 * W)
    # bf16 matmul inputs -> loosen tolerance vs the f32 reference.
    max_err = float(jnp.max(jnp.abs(y - y_ref)))
    assert jnp.allclose(y, y_ref, atol=2e-2, rtol=2e-2), f"mismatch, max|err|={max_err}"

    print("KERNEL_OK")
</pallas_src>

<mosaic_0001>
module attributes {stable_mosaic.version = 11 : i64} {
  func.func @convtranspose_kernel(%arg0: i32, %arg1: i32, %arg2: memref<1x256x4xbf16, #tpu.memory_space<vmem>>, %arg3: memref<2x4x16xbf16, #tpu.memory_space<vmem>>, %arg4: memref<1x16xf32, #tpu.memory_space<vmem>>, %arg5: memref<1x16x2x16x16xf32, #tpu.memory_space<vmem>>) attributes {dimension_semantics = [#tpu.dimension_semantics<parallel>, #tpu.dimension_semantics<parallel>], iteration_bounds = array<i64: 2, 1>, scalar_prefetch = 0 : i64, scratch_operands = 0 : i64, tpu.core_type = #tpu.core_type<tc>, window_params = [{transform_indices = @transform_0, window_bounds = array<i64: 1, 256, 4>}, {pipeline_mode = #tpu.pipeline_mode<synchronous>, transform_indices = @transform_1, window_bounds = array<i64: 2, 4, 16>}, {pipeline_mode = #tpu.pipeline_mode<synchronous>, transform_indices = @transform_2, window_bounds = array<i64: 1, 16>}, {transform_indices = @transform_3, window_bounds = array<i64: 1, 16, 2, 16, 16>}]} {
    %c0 = arith.constant 0 : index
    %c0_0 = arith.constant 0 : index
    %c0_1 = arith.constant 0 : index
    %0 = vector.load %arg2[%c0, %c0_0, %c0_1] : memref<1x256x4xbf16, #tpu.memory_space<vmem>>, vector<1x256x4xbf16>
    %1 = vector.shape_cast %0 : vector<1x256x4xbf16> to vector<256x4xbf16>
    %c0_2 = arith.constant 0 : index
    %c0_3 = arith.constant 0 : index
    %2 = vector.load %arg4[%c0_2, %c0_3] : memref<1x16xf32, #tpu.memory_space<vmem>>, vector<1x16xf32>
    %c0_4 = arith.constant 0 : index
    %c0_5 = arith.constant 0 : index
    %c0_6 = arith.constant 0 : index
    %3 = vector.load %arg3[%c0_4, %c0_5, %c0_6] : memref<2x4x16xbf16, #tpu.memory_space<vmem>>, vector<1x4x16xbf16>
    %4 = vector.shape_cast %3 : vector<1x4x16xbf16> to vector<4x16xbf16>
    %cst = arith.constant dense<0.000000e+00> : vector<256x16xf32>
    %5 = tpu.matmul %1, %4, %cst {dimension_numbers = #tpu.dot_dimension_numbers<[1], [0], [0], [1], [0, 0, 1, 1], [], []>} : vector<256x4xbf16>, vector<4x16xbf16>, vector<256x16xf32> -> vector<256x16xf32>
    %6 = vector.broadcast %2 : vector<1x16xf32> to vector<256x16xf32>
    %7 = arith.addf %5, %6 : vector<256x16xf32>
    %8 = arith.negf %7 : vector<256x16xf32>
    %9 = math.exp %8 : vector<256x16xf32>
    %cst_7 = arith.constant 1.000000e+00 : f32
    %10 = vector.broadcast %cst_7 : f32 to vector<256x16xf32>
    %11 = arith.addf %10, %9 : vector<256x16xf32>
    %12 = arith.divf %10, %11 : vector<256x16xf32>
    %13 = arith.mulf %7, %12 : vector<256x16xf32>
    %14 = vector.shape_cast %13 : vector<256x16xf32> to vector<16x16x16xf32>
    %c0_8 = arith.constant 0 : index
    %c0_9 = arith.constant 0 : index
    %c0_10 = arith.constant 0 : index
    %c0_11 = arith.constant 0 : index
    %c0_12 = arith.constant 0 : index
    %15 = vector.load %arg5[%c0_8, %c0_9, %c0_10, %c0_11, %c0_12] : memref<1x16x2x16x16xf32, #tpu.memory_space<vmem>>, vector<1x16x1x16x16xf32>
    %16 = vector.shape_cast %15 : vector<1x16x1x16x16xf32> to vector<16x16x16xf32>
    %17 = vector.shape_cast %14 : vector<16x16x16xf32> to vector<1x16x1x16x16xf32>
    tpu.vector_store %arg5[%c0_8, %c0_9, %c0_10, %c0_11, %c0_12], %17 {strides = array<i32>} : memref<1x16x2x16x16xf32, #tpu.memory_space<vmem>>, vector<1x16x1x16x16xf32>,
    %c1 = arith.constant 1 : index
    %c0_13 = arith.constant 0 : index
    %c0_14 = arith.constant 0 : index
    %18 = vector.load %arg3[%c1, %c0_13, %c0_14] : memref<2x4x16xbf16, #tpu.memory_space<vmem>>, vector<1x4x16xbf16>
    %19 = vector.shape_cast %18 : vector<1x4x16xbf16> to vector<4x16xbf16>
    %cst_15 = arith.constant dense<0.000000e+00> : vector<256x16xf32>
    %20 = tpu.matmul %1, %19, %cst_15 {dimension_numbers = #tpu.dot_dimension_numbers<[1], [0], [0], [1], [0, 0, 1, 1], [], []>} : vector<256x4xbf16>, vector<4x16xbf16>, vector<256x16xf32> -> vector<256x16xf32>
    %21 = vector.broadcast %2 : vector<1x16xf32> to vector<256x16xf32>
    %22 = arith.addf %20, %21 : vector<256x16xf32>
    %23 = arith.negf %22 : vector<256x16xf32>
    %24 = math.exp %23 : vector<256x16xf32>
    %cst_16 = arith.constant 1.000000e+00 : f32
    %25 = vector.broadcast %cst_16 : f32 to vector<256x16xf32>
    %26 = arith.addf %25, %24 : vector<256x16xf32>
    %27 = arith.divf %25, %26 : vector<256x16xf32>
    %28 = arith.mulf %22, %27 : vector<256x16xf32>
    %29 = vector.shape_cast %28 : vector<256x16xf32> to vector<16x16x16xf32>
    %c0_17 = arith.constant 0 : index
    %c0_18 = arith.constant 0 : index
    %c1_19 = arith.constant 1 : index
    %c0_20 = arith.constant 0 : index
    %c0_21 = arith.constant 0 : index
    %30 = vector.load %arg5[%c0_17, %c0_18, %c1_19, %c0_20, %c0_21] : memref<1x16x2x16x16xf32, #tpu.memory_space<vmem>>, vector<1x16x1x16x16xf32>
    %31 = vector.shape_cast %30 : vector<1x16x1x16x16xf32> to vector<16x16x16xf32>
    %32 = vector.shape_cast %29 : vector<16x16x16xf32> to vector<1x16x1x16x16xf32>
    tpu.vector_store %arg5[%c0_17, %c0_18, %c1_19, %c0_20, %c0_21], %32 {strides = array<i32>} : memref<1x16x2x16x16xf32, #tpu.memory_space<vmem>>, vector<1x16x1x16x16xf32>,
    return
  }
  func.func @transform_0(%arg0: i32, %arg1: i32) -> (i32, i32, i32) {
    %c0_i32 = arith.constant 0 : i32
    %c0_i32_0 = arith.constant 0 : i32
    return %arg0, %arg1, %c0_i32 : i32, i32, i32
  }
  func.func @transform_1(%arg0: i32, %arg1: i32) -> (i32, i32, i32) {
    %c0_i32 = arith.constant 0 : i32
    %c0_i32_0 = arith.constant 0 : i32
    %c0_i32_1 = arith.constant 0 : i32
    %c0_i32_2 = arith.constant 0 : i32
    return %c0_i32, %c0_i32_0, %c0_i32_1 : i32, i32, i32
  }
  func.func @transform_2(%arg0: i32, %arg1: i32) -> (i32, i32) {
    %c0_i32 = arith.constant 0 : i32
    %c0_i32_0 = arith.constant 0 : i32
    %c0_i32_1 = arith.constant 0 : i32
    return %c0_i32, %c0_i32_0 : i32, i32
  }
  func.func @transform_3(%arg0: i32, %arg1: i32) -> (i32, i32, i32, i32, i32) {
    %c0_i32 = arith.constant 0 : i32
    %c0_i32_0 = arith.constant 0 : i32
    %c0_i32_1 = arith.constant 0 : i32
    %c0_i32_2 = arith.constant 0 : i32
    return %arg0, %arg1, %c0_i32, %c0_i32_0, %c0_i32_1 : i32, i32, i32, i32, i32
  }
}

</mosaic_0001>

<bundles_post_ra>
// kernel: tpu_custom_call.1
= control target key start
LH: loop header
LB: loop body
LE: loop exit
PB: predicated region body
PF: predicated region fallthrough
CT: control target
= control target key end

     0   :  { %8 = vsyncpa [#allocation3], 0  ;;  %s2654_s0 = inlined_call_operand.vmem [shape: bf16[2,256,4], index: 0, kind: input, shape index: {}]   ;;  %s2655_s1 = inlined_call_operand.vmem [shape: bf16[2,4,16], index: 1, kind: input, shape index: {}]   ;;  %s2656_s2 = inlined_call_operand.vmem [shape: f32[1,16], index: 2, kind: input, shape index: {}]   ;;  %s2657_s3 = inlined_call_operand.hbm [shape: f32[2,16,2,16,16], index: 3, kind: output, shape index: {}]  }
   0x1   :  { %10 = vsyncpa [#allocation3 + $0x1], 0  ;;  %s2007_s12 = smov 0   ;;  %s2009_s13 = smov 0  }
   0x2   :  { %s2011_s14 = smov 0   ;;  %s2013_s15 = smov 0  }
   0x3   :  { %s2015_s16 = smov 0   ;;  %s2017_s17 = smov 0  }
   0x4 LB: > { %s1311_s18 = sadd.s32 4294967295, %s1982_s17   ;;  %s1312_s19 = sadd.s32 4294967294, %s1982_s17   ;;  %s1982_s17 = sphi %s2017_s17, %s16_s17   ;;  %s1978_s16 = sphi %s2015_s16, %s2664_s16   ;;  %s1974_s15 = sphi %s2013_s15, %s2663_s15   ;;  %s1970_s14 = sphi %s2011_s14, %s2662_s14   ;;  %s1966_s13 = sphi %s2009_s13, %s2661_s13   ;;  %s1962_s12 = sphi %s2007_s12, %s2660_s12  }
   0x5   : > { %s28_s20 = sadd.s32 1, %s1978_s16  ;;  %s107_s21 = sadd.s32 1, %s1970_s14 }
   0x6   : > { %p30_p0 = scmp.ge.s32.totalorder %s28_s20, 2  ;;  %p117_p1 = scmp.ne.s32.totalorder %s1970_s14, %s1966_s13 }
   0x7   : > { %p118_p2 = scmp.eq.s32.totalorder %s1311_s18, 1  ;;  %p123_p3 = scmp.ne.s32.totalorder %s1966_s13, %s1962_s12 }
   0x8   : > { %s2666_s20 = smov (%p30_p0, %s28_s20), 0  ;;  %p124_p5 = scmp.eq.s32.totalorder %s1312_s19, 1 }
   0x9   : > { %p2047_p4 = por %p118_p2, %p117_p1  ;;  %s102_s23 = ssub.s32 %s1978_s16, %s2666_s20 }
   0xa   : > { %p1315_p6 = scmp.ge.s32.totalorder %s1982_s17, 1  ;;  %p105_p7 = scmp.eq.s32.totalorder %s102_s23, 0 }
   0xb   : > { %p2054_p8 = por %p124_p5, %p123_p3  ;;  %p161_p9 = scmp.lt.s32.totalorder %s1982_s17, 3 }
   0xc   : > { %s2060_s25 = scalar_select %p105_p7, %s1970_s14, %s107_s21  }
   0xd   : > { %p162_p10 = pnand %p1315_p6, %p161_p9 }
   0xe   : > { %p190_p11 = scmp.lt.s32.totalorder (!%p162_p10), %s1974_s15, 1  ;;  %s186_s10 = sand.u32 (!%p162_p10), 1, %s1966_s13  }
   0xf   : > { %165 = sbr.rel (%p162_p10) target bundleno = 380 (0x17c), region = 32  ;;  %s2201_s11 = sshll.u32 (!%p162_p10), %s186_s10, 9 }
  0x10   : > { %s2228_s18 = scalar_lea.vmem (!%p162_p10), [#allocation2], %s2201_s11  ;;  %s1471_s23 = sshll.u32 (!%p162_p10), %s1974_s15, 13 }
  0x11   : > { %s1232_s26 = sshll.u32 (!%p162_p10), %s2228_s18, 4  ;;  %s2596_s28 = scalar_lea.hbm (!%p162_p10), %s2657_s3, %s1471_s23  ;;  %s2598_s26 = int_to_ptr.vmem [resolvable:$true] %s1232_s26 }
  0x12   : > { %s2609_s29 = scalar_lea.sflag (!%p162_p10), [#allocation3], %s186_s10 }
  0x14   : > { %v234_v0 = vld [vmem:[%s2655_s1] sm:$0x3]  ;;  %vm370_vm0 = vcmask 1041408   ;;  %v1384_v1 = vld [vmem:[%s2655_s1 + $0x2] sm:$0x3]  ;;  %s191_s30 = scalar_select %p190_p11, %s1974_s15, 1 }
  0x15   : > { %1574 = vmatprep.subr.msk.bf16.mxu0 %vm370_vm0, %v234_v0  ;;  %1575 = vmatprep.subr.msk.bf16.mxu1 %vm370_vm0, %v1384_v1  ;;  %v372_v2 = vsel %vm370_vm0, %v234_v0, 0  ;;  %v795_v3 = vsel %vm370_vm0, %v1384_v1, 0  ;;  %vm321_vm1 = vcmask 31744   ;;  %v2126_v20 = vld [vmem:[%s2656_s2] ss:$0 sm:$0xff]  ;;  %vm759_vm2 = vcmask 130048  }
  0x16   : > { %1507 = vmatpush3.bf16.msra.mxu0 %v372_v2  ;;  %1541 = vmatpush3.bf16.msra.mxu1 %v795_v3  ;;  %s1470_s4 = sshll.u32 %s191_s30, 7  ;;  %s1906_s30 = scalar_lea.vmem %s2598_s26, 8192 }
  0x17   : > { %s2073_s7 = scalar_lea.vmem %s2654_s0, %s1470_s4  ;;  %p1907_p12 = scmp.ne.s32.totalorder %s2598_s26, %s1906_s30 }
  0x18   : > { %v1633_v4 = vld [vmem:[%s2073_s7] sm:$0xff]   ;;  %v1634_v5 = vld [vmem:[%s2073_s7 + $0x8] sm:$0xff]   ;;  %v1635_v6 = vld [vmem:[%s2073_s7 + $0x10] sm:$0xff]   ;;  %s1984_s4 = smov [#allocation2]  }
  0x19   : > { %1508 = vmatprep.mubr.msk.bf16.mxu0 %vm321_vm1, %v1633_v4  ;;  %1542 = vmatprep.mubr.msk.bf16.mxu1 %vm321_vm1, %v1633_v4  ;;  %v1636_v7 = vld [vmem:[%s2073_s7 + $0x18] sm:$0xff]   ;;  %v1637_v8 = vld [vmem:[%s2073_s7 + $0x20] sm:$0xff]   ;;  %v1638_v9 = vld [vmem:[%s2073_s7 + $0x28] sm:$0xff]   ;;  %p1908_p13 = pnand %p1907_p12, %p2047_p4  ;;  %s1910_s5 = sshll.u32 %s1984_s4, 4  ;;  %s1911_s5 = int_to_ptr.vmem [resolvable:$false] %s1910_s5 }
  0x1a   : > { %1509 = vmatmul.mubr.msk.bf16.vlgmr.msra.gmra.mxu0 %vm321_vm1, %v1634_v5  ;;  %1543 = vmatmul.mubr.msk.bf16.vlgmr.msra.gmra.mxu1 %vm321_vm1, %v1634_v5  ;;  %v1639_v10 = vld [vmem:[%s2073_s7 + $0x30] sm:$0xff]   ;;  %v1640_v11 = vld [vmem:[%s2073_s7 + $0x38] sm:$0xff]   ;;  %v1641_v12 = vld [vmem:[%s2073_s7 + $0x40] sm:$0xff]   ;;  %s1912_s6 = scalar_lea.vmem %s1911_s5, 16384  ;;  %p1913_p1 = scmp.lt.s32.totalorder %s2598_s26, %s1911_s5 }
  0x1b   : > { %1512 = vmatprep.mubr.msk.bf16.mxu0 %vm321_vm1, %v1635_v6  ;;  %1546 = vmatprep.mubr.msk.bf16.mxu1 %vm321_vm1, %v1635_v6  ;;  %v1642_v13 = vld [vmem:[%s2073_s7 + $0x48] sm:$0xff]   ;;  %v1643_v14 = vld [vmem:[%s2073_s7 + $0x50] sm:$0xff]   ;;  %v1644_v15 = vld [vmem:[%s2073_s7 + $0x58] sm:$0xff]   ;;  %p1909_p0 = pneg %p1908_p13  ;;  %p1914_p2 = scmp.lt.s32.totalorder %s1912_s6, %s1906_s30 }
  0x1c   : > { %v1645_v16 = vld [vmem:[%s2073_s7 + $0x60] sm:$0xff]   ;;  %v1646_v17 = vld [vmem:[%s2073_s7 + $0x68] sm:$0xff]   ;;  %v1647_v18 = vld [vmem:[%s2073_s7 + $0x70] sm:$0xff]  }
  0x1d   : > { %v1648_v19 = vld [vmem:[%s2073_s7 + $0x78] sm:$0xff]   ;;  %p1915_p3 = por %p1914_p2, %p1913_p1 }
  0x1f   : > { %p1916_p5 = pnand %p1915_p3, %p1909_p0 }
  0x22   : > { %1513 = vmatmul.mubr.msk.bf16.gmra.mxu0 %vm321_vm1, %v1636_v7  ;;  %1547 = vmatmul.mubr.msk.bf16.gmra.mxu1 %vm321_vm1, %v1636_v7 }
  0x23   : > { %1516 = vmatprep.mubr.msk.bf16.mxu0 %vm321_vm1, %v1637_v8  ;;  %1550 = vmatprep.mubr.msk.bf16.mxu1 %vm321_vm1, %v1637_v8 }
  0x2a   : > { %1517 = vmatmul.mubr.msk.bf16.gmra.mxu0 %vm321_vm1, %v1638_v9  ;;  %1551 = vmatmul.mubr.msk.bf16.gmra.mxu1 %vm321_vm1, %v1638_v9 }
  0x2b   : > { %1520 = vmatprep.mubr.msk.bf16.mxu0 %vm321_vm1, %v1639_v10  ;;  %1554 = vmatprep.mubr.msk.bf16.mxu1 %vm321_vm1, %v1639_v10 }
  0x32   : > { %1521 = vmatmul.mubr.msk.bf16.gmra.mxu0 %vm321_vm1, %v1640_v11  ;;  %1555 = vmatmul.mubr.msk.bf16.gmra.mxu1 %vm321_vm1, %v1640_v11 }
  0x33   : > { %1524 = vmatprep.mubr.msk.bf16.mxu0 %vm321_vm1, %v1641_v12  ;;  %1558 = vmatprep.mubr.msk.bf16.mxu1 %vm321_vm1, %v1641_v12 }
  0x3a   : > { %1525 = vmatmul.mubr.msk.bf16.gmra.mxu0 %vm321_vm1, %v1642_v13  ;;  %1559 = vmatmul.mubr.msk.bf16.gmra.mxu1 %vm321_vm1, %v1642_v13 }
  0x3b   : > { %1528 = vmatprep.mubr.msk.bf16.mxu0 %vm321_vm1, %v1643_v14  ;;  %1562 = vmatprep.mubr.msk.bf16.mxu1 %vm321_vm1, %v1643_v14 }
  0x42   : > { %1529 = vmatmul.mubr.msk.bf16.gmra.mxu0 %vm321_vm1, %v1644_v15  ;;  %1563 = vmatmul.mubr.msk.bf16.gmra.mxu1 %vm321_vm1, %v1644_v15 }
  0x43   : > { %1532 = vmatprep.mubr.msk.bf16.mxu0 %vm321_vm1, %v1645_v16  ;;  %1566 = vmatprep.mubr.msk.bf16.mxu1 %vm321_vm1, %v1645_v16 }
  0x4a   : > { %1533 = vmatmul.mubr.msk.bf16.gmra.mxu0 %vm321_vm1, %v1646_v17  ;;  %1567 = vmatmul.mubr.msk.bf16.gmra.mxu1 %vm321_vm1, %v1646_v17 }
  0x4b   : > { %1536 = vmatprep.mubr.msk.bf16.mxu0 %vm321_vm1, %v1647_v18  ;;  %1570 = vmatprep.mubr.msk.bf16.mxu1 %vm321_vm1, %v1647_v18 }
  0x52   : > { %1537 = vmatmul.mubr.msk.bf16.gmra.mxu0 %vm321_vm1, %v1648_v19  ;;  %1571 = vmatmul.mubr.msk.bf16.gmra.mxu1 %vm321_vm1, %v1648_v19 }
  0xda   : > { %v1510_v21 = vpop.f32.mrf.mxu0  ;;  %v1544_v22 = vpop.f32.mrf.mxu1 }
  0xdb   : > { %v2129_v23 = vadd.f32 %v1510_v21, %v2126_v20  ;;  %v2132_v24 = vadd.f32 %v1544_v22, %v2126_v20 }
  0xdc   : > { %v408_v25 = vpop.f32.mrf.mxu0  ;;  %v831_v26 = vpop.f32.mrf.mxu1 }
  0xdd   : > { %v1354_v27 = vmul.f32 -1.442695, %v2129_v23  ;;  %v1403_v28 = vmul.f32 -1.442695, %v2132_v24  ;;  %v2137_v29 = vadd.f32 %v2126_v20, %v408_v25  ;;  %v2140_v30 = vadd.f32 %v2126_v20, %v831_v26 }
  0xde   : > { %v1511_v31 = vpop.f32.mrf.mxu0  ;;  %v1545_v32 = vpop.f32.mrf.mxu1 }
  0xdf   : > { %1649 = vpow2.f32 %v1354_v27  ;;  %v1352_v33 = vmul.f32 -1.442695, %v2137_v29  ;;  %v1401_v34 = vmul.f32 -1.442695, %v2140_v30  ;;  %v2145_v35 = vadd.f32 %v1511_v31, %v2126_v20 }
  0xe0   : > { %1651 = vpow2.f32 %v1403_v28  ;;  %v2148_v36 = vadd.f32 %v1545_v32, %v2126_v20  ;;  %v411_v37 = vpop.f32.mrf.mxu0  ;;  %v834_v38 = vpop.f32.mrf.mxu1 }
  0xe1   : > { %1653 = vpow2.f32 %v1352_v33  ;;  %v1355_v39 = vmul.f32 -1.442695, %v2145_v35  ;;  %v2152_v40 = vadd.f32 %v2126_v20, %v411_v37  ;;  %v2155_v41 = vadd.f32 %v2126_v20, %v834_v38 }
  0xe2   : > { %1655 = vpow2.f32 %v1401_v34  ;;  %v1404_v42 = vmul.f32 -1.442695, %v2148_v36  ;;  %v1514_v43 = vpop.f32.mrf.mxu0  ;;  %v1548_v44 = vpop.f32.mrf.mxu1 }
  0xe3   : > { %1657 = vpow2.f32 %v1355_v39  ;;  %v1353_v45 = vmul.f32 -1.442695, %v2152_v40  ;;  %v1402_v46 = vmul.f32 -1.442695, %v2155_v41  ;;  %v2161_v47 = vadd.f32 %v1514_v43, %v2126_v20 }
  0xe4   : > { %1659 = vpow2.f32 %v1404_v42  ;;  %v2164_v48 = vadd.f32 %v1548_v44, %v2126_v20  ;;  %v424_v49 = vpop.f32.mrf.mxu0  ;;  %v847_v50 = vpop.f32.mrf.mxu1 }
  0xe5   : > { %1661 = vpow2.f32 %v1353_v45  ;;  %v1358_v51 = vmul.f32 -1.442695, %v2161_v47  ;;  %v2168_v52 = vadd.f32 %v2126_v20, %v424_v49  ;;  %v2171_v53 = vadd.f32 %v2126_v20, %v847_v50 }
  0xe6   : > { %1663 = vpow2.f32 %v1402_v46  ;;  %v1407_v54 = vmul.f32 -1.442695, %v2164_v48  ;;  %v1515_v55 = vpop.f32.mrf.mxu0  ;;  %v1549_v56 = vpop.f32.mrf.mxu1 }
  0xe7   : > { %1665 = vpow2.f32 %v1358_v51  ;;  %v1356_v57 = vmul.f32 -1.442695, %v2168_v52  ;;  %v1405_v58 = vmul.f32 -1.442695, %v2171_v53  ;;  %v2177_v59 = vadd.f32 %v1515_v55, %v2126_v20 }
  0xe8   : > { %1667 = vpow2.f32 %v1407_v54  ;;  %v2180_v60 = vadd.f32 %v1549_v56, %v2126_v20  ;;  %v427_v61 = vpop.f32.mrf.mxu0  ;;  %v850_v62 = vpop.f32.mrf.mxu1 }
  0xe9   : > { %1669 = vpow2.f32 %v1356_v57  ;;  %v1359_v63 = vmul.f32 -1.442695, %v2177_v59  ;;  %v2184_v0 = vadd.f32 %v2126_v20, %v427_v61  ;;  %v2187_v1 = vadd.f32 %v2126_v20, %v850_v62 }
  0xea   : > { %1671 = vpow2.f32 %v1405_v58  ;;  %v1408_v2 = vmul.f32 -1.442695, %v2180_v60  ;;  %v1518_v3 = vpop.f32.mrf.mxu0  ;;  %v1552_v4 = vpop.f32.mrf.mxu1 }
  0xeb   : > { %1673 = vpow2.f32 %v1359_v63  ;;  %v1357_v5 = vmul.f32 -1.442695, %v2184_v0  ;;  %v1406_v6 = vmul.f32 -1.442695, %v2187_v1  ;;  %v2194_v46 = vadd.f32 %v1518_v3, %v2126_v20 }
  0xec   : > { %v1650_v7 = vpop.eup %1649  ;;  %1675 = vpow2.f32 %v1408_v2  ;;  %v440_v8 = vpop.f32.mrf.mxu0  ;;  %v2197_v54 = vadd.f32 %v1552_v4, %v2126_v20 }
  0xed   : > { %v863_v9 = vpop.f32.mrf.mxu1  ;;  %v1652_v10 = vpop.eup %1651  ;;  %v633_v11 = vadd.f32 1.0, %v1650_v7  ;;  %1677 = vpow2.f32 %v1357_v5  ;;  %v2204_v57 = vadd.f32 %v2126_v20, %v440_v8  ;;  %v1362_v4 = vmul.f32 -1.442695, %v2194_v46 }
  0xee   : > { %v1654_v12 = vpop.eup %1653  ;;  %v1056_v13 = vadd.f32 1.0, %v1652_v10  ;;  %1679 = vpow2.f32 %v1406_v6  ;;  %v1519_v14 = vpop.f32.mrf.mxu0  ;;  %v2207_v62 = vadd.f32 %v2126_v20, %v863_v9  ;;  %v1411_v10 = vmul.f32 -1.442695, %v2197_v54 }
  0xef   : > { %v1656_v15 = vpop.eup %1655  ;;  %1681 = vrcp.f32 %v633_v11  ;;  %v631_v16 = vadd.f32 1.0, %v1654_v12  ;;  %v1553_v17 = vpop.f32.mrf.mxu1  ;;  %v2211_v5 = vadd.f32 %v1519_v14, %v2126_v20 }
  0xf0   : > { %v1658_v18 = vpop.eup %1657  ;;  %1683 = vrcp.f32 %v1056_v13  ;;  %v1054_v19 = vadd.f32 1.0, %v1656_v15  ;;  %v443_v27 = vpop.f32.mrf.mxu0  ;;  %v2215_v11 = vadd.f32 %v1553_v17, %v2126_v20  ;;  %v1360_v13 = vmul.f32 -1.442695, %v2204_v57 }
  0xf1   : > { %v1660_v21 = vpop.eup %1659  ;;  %1685 = vrcp.f32 %v631_v16  ;;  %v634_v22 = vadd.f32 1.0, %v1658_v18  ;;  %v866_v32 = vpop.f32.mrf.mxu1  ;;  %v2220_v15 = vadd.f32 %v2126_v20, %v443_v27  ;;  %v1409_v18 = vmul.f32 -1.442695, %v2207_v62 }
  0xf2   : > { %v1662_v25 = vpop.eup %1661  ;;  %1687 = vrcp.f32 %v1054_v19  ;;  %v1057_v26 = vadd.f32 1.0, %v1660_v21  ;;  %v1522_v43 = vpop.f32.mrf.mxu0  ;;  %v2225_v19 = vadd.f32 %v2126_v20, %v866_v32 }
  0xf3   : > { %v1664_v28 = vpop.eup %1663  ;;  %1689 = vrcp.f32 %v634_v22  ;;  %v632_v31 = vadd.f32 1.0, %v1662_v25  ;;  %v1556_v49 = vpop.f32.mrf.mxu1  ;;  %v2235_v22 = vadd.f32 %v1522_v43, %v2126_v20 }
  0xf4   : > { %v1666_v33 = vpop.eup %1665  ;;  %1691 = vrcp.f32 %v1057_v26  ;;  %v1055_v34 = vadd.f32 1.0, %v1664_v28  ;;  %v456_v63 = vpop.f32.mrf.mxu0  ;;  %v1412_v28 = vmul.f32 -1.442695, %v2215_v11 }
  0xf5   : > { %v1668_v37 = vpop.eup %1667  ;;  %1693 = vrcp.f32 %v632_v31  ;;  %v637_v38 = vadd.f32 1.0, %v1666_v33  ;;  %v879_v6 = vpop.f32.mrf.mxu1  ;;  %v2242_v31 = vadd.f32 %v1556_v49, %v2126_v20  ;;  %v1361_v33 = vmul.f32 -1.442695, %v2220_v15 }
  0xf6   : > { %v1670_v39 = vpop.eup %1669  ;;  %1695 = vrcp.f32 %v1055_v34  ;;  %v1060_v42 = vadd.f32 1.0, %v1668_v37  ;;  %v1523_v17 = vpop.f32.mrf.mxu0  ;;  %v2249_v34 = vadd.f32 %v2126_v20, %v456_v63 }
  0xf7   : > { %v1672_v44 = vpop.eup %1671  ;;  %1697 = vrcp.f32 %v637_v38  ;;  %v635_v45 = vadd.f32 1.0, %v1670_v39  ;;  %v1557_v25 = vpop.f32.mrf.mxu1  ;;  %v1410_v38 = vmul.f32 -1.442695, %v2225_v19  ;;  %v2256_v39 = vadd.f32 %v2126_v20, %v879_v6 }
  0xf8   : > { %v1674_v50 = vpop.eup %1673  ;;  %1699 = vrcp.f32 %v1060_v42  ;;  %v1058_v51 = vadd.f32 1.0, %v1672_v44  ;;  %v1366_v44 = vmul.f32 -1.442695, %v2235_v22 }
  0xf9   : > { %v1676_v55 = vpop.eup %1675  ;;  %1701 = vrcp.f32 %v635_v45  ;;  %v638_v56 = vadd.f32 1.0, %v1674_v50  ;;  %v2263_v45 = vadd.f32 %v1523_v17, %v2126_v20 }
  0xfa   : > { %v1678_v58 = vpop.eup %1677  ;;  %1703 = vrcp.f32 %v1058_v51  ;;  %v1061_v61 = vadd.f32 1.0, %v1676_v55  ;;  %v1415_v51 = vmul.f32 -1.442695, %v2242_v31  ;;  %v2270_v55 = vadd.f32 %v1557_v25, %v2126_v20 }
  0xfb   : > { %v1680_v2 = vpop.eup %1679  ;;  %1705 = vrcp.f32 %v638_v56  ;;  %v636_v3 = vadd.f32 1.0, %v1678_v58  ;;  %v1364_v58 = vmul.f32 -1.442695, %v2249_v34 }
  0xfc   : > { %v1682_v7 = vpop.eup %1681  ;;  %1707 = vrcp.f32 %v1061_v61  ;;  %v1059_v8 = vadd.f32 1.0, %v1680_v2  ;;  %v1413_v2 = vmul.f32 -1.442695, %v2256_v39 }
  0xfd   : > { %v1684_v9 = vpop.eup %1683  ;;  %v729_v12 = vmul.f32 %v1682_v7, %v2129_v23  ;;  %1709 = vrcp.f32 %v636_v3  ;;  %v1367_v7 = vmul.f32 -1.442695, %v2263_v45 }
  0xfe   : > { %v1686_v14 = vpop.eup %1685  ;;  %v1152_v16 = vmul.f32 %v1684_v9, %v2132_v24  ;;  %1711 = vrcp.f32 %v1059_v8  ;;  %v1363_v24 = vmul.f32 -1.442695, %v2211_v5  ;;  %v1416_v9 = vmul.f32 -1.442695, %v2270_v55 }
  0xff   : > { %v1688_v21 = vpop.eup %1687  ;;  %762 = vst.msk [vmem:[%s2228_s18 + $0x20] sm:$0xff] %vm759_vm2, %v729_v12  ;;  %v727_v23 = vmul.f32 %v1686_v14, %v2137_v29  ;;  %1713 = vpow2.f32 %v1362_v4 }
 0x100   : > { %v1690_v26 = vpop.eup %1689  ;;  %1435 = vst.msk [vmem:[%s2228_s18 + $0x30] sm:$0xff] %vm759_vm2, %v1152_v16  ;;  %v1150_v27 = vmul.f32 %v1688_v21, %v2140_v30  ;;  %1715 = vpow2.f32 %v1411_v10 }
 0x101   : > { %v1692_v29 = vpop.eup %1691  ;;  %760 = vst.msk [vmem:[%s2228_s18] sm:$0xff] %vm759_vm2, %v727_v23  ;;  %v730_v32 = vmul.f32 %v1690_v26, %v2145_v35  ;;  %1717 = vpow2.f32 %v1360_v13  ;;  %v459_v35 = vpop.f32.mrf.mxu0 }
 0x102   : > { %v1694_v30 = vpop.eup %1693  ;;  %1433 = vst.msk [vmem:[%s2228_s18 + $0x10] sm:$0xff] %vm759_vm2, %v1150_v27  ;;  %v1153_v37 = vmul.f32 %v1692_v29, %v2148_v36  ;;  %1719 = vpow2.f32 %v1409_v18  ;;  %v882_v36 = vpop.f32.mrf.mxu1  ;;  %v2277_v61 = vadd.f32 %v2126_v20, %v459_v35 }
 0x103   : > { %v1696_v42 = vpop.eup %1695  ;;  %763 = vst.msk [vmem:[%s2228_s18 + $0x28] sm:$0xff] %vm759_vm2, %v730_v32  ;;  %v728_v43 = vmul.f32 %v1694_v30, %v2152_v40  ;;  %1721 = vpow2.f32 %v1363_v24  ;;  %v2284_v3 = vadd.f32 %v2126_v20, %v882_v36 }
 0x104   : > { %v1698_v49 = vpop.eup %1697  ;;  %1436 = vst.msk [vmem:[%s2228_s18 + $0x38] sm:$0xff] %vm759_vm2, %v1153_v37  ;;  %v1151_v50 = vmul.f32 %v1696_v42, %v2155_v41  ;;  %1723 = vpow2.f32 %v1412_v28  ;;  %v2292_v8 = vpop.f32.mrf.mxu1  ;;  %v1365_v13 = vmul.f32 -1.442695, %v2277_v61 }
 0x105   : > { %v1700_v40 = vpop.eup %1699  ;;  %761 = vst.msk [vmem:[%s2228_s18 + $0x8] sm:$0xff] %vm759_vm2, %v728_v43  ;;  %v733_v56 = vmul.f32 %v1698_v49, %v2161_v47  ;;  %1725 = vpow2.f32 %v1361_v33  ;;  %v2286_v47 = vpop.f32.mrf.mxu0 }
 0x106   : > { %v1702_v41 = vpop.eup %1701  ;;  %1434 = vst.msk [vmem:[%s2228_s18 + $0x18] sm:$0xff] %vm759_vm2, %v1151_v50  ;;  %v1156_v63 = vmul.f32 %v1700_v40, %v2164_v48  ;;  %1727 = vpow2.f32 %v1410_v38 }
 0x107   : > { %v1704_v4 = vpop.eup %1703  ;;  %766 = vst.msk [vmem:[%s2228_s18 + $0x60] sm:$0xff] %vm759_vm2, %v733_v56  ;;  %v731_v6 = vmul.f32 %v1702_v41, %v2168_v52  ;;  %1729 = vpow2.f32 %v1366_v44  ;;  %v472_v18 = vpop.f32.mrf.mxu0 }
 0x108   : > { %v1706_v48 = vpop.eup %1705  ;;  %1439 = vst.msk [vmem:[%s2228_s18 + $0x70] sm:$0xff] %vm759_vm2, %v1156_v63  ;;  %v1154_v10 = vmul.f32 %v1704_v4, %v2171_v53  ;;  %1731 = vpow2.f32 %v1415_v51  ;;  %v1414_v53 = vmul.f32 -1.442695, %v2284_v3  ;;  %v2318_v4 = vadd.f32 %v2286_v47, %v2126_v20 }
 0x109   : > { %v1708_v12 = vpop.eup %1707  ;;  %764 = vst.msk [vmem:[%s2228_s18 + $0x40] sm:$0xff] %vm759_vm2, %v731_v6  ;;  %v734_v52 = vmul.f32 %v1706_v48, %v2177_v59  ;;  %1733 = vpow2.f32 %v1364_v58  ;;  %v895_v59 = vpop.f32.mrf.mxu1 }
 0x10a   : > { %v1710_v14 = vpop.eup %1709  ;;  %1437 = vst.msk [vmem:[%s2228_s18 + $0x50] sm:$0xff] %vm759_vm2, %v1154_v10  ;;  %v1157_v16 = vmul.f32 %v1708_v12, %v2180_v60  ;;  %1735 = vpow2.f32 %v1413_v2  ;;  %v1527_v28 = vpop.f32.mrf.mxu0  ;;  %v2322_v10 = vadd.f32 %v2292_v8, %v2126_v20  ;;  %v2328_v47 = vadd.f32 %v2126_v20, %v895_v59 }
 0x10b   : > { %v1712_v17 = vpop.eup %1711  ;;  %767 = vst.msk [vmem:[%s2228_s18 + $0x68] sm:$0xff] %vm759_vm2, %v734_v52  ;;  %v732_v21 = vmul.f32 %v1710_v14, %v2184_v0  ;;  %1737 = vpow2.f32 %v1367_v7  ;;  %v1561_v32 = vpop.f32.mrf.mxu1  ;;  %v2325_v52 = vadd.f32 %v2126_v20, %v472_v18  ;;  %v2332_v8 = vadd.f32 %v1527_v28, %v2126_v20 }
 0x10c   : > { %v1714_v23 = vpop.eup %1713  ;;  %1440 = vst.msk [vmem:[%s2228_s18 + $0x78] sm:$0xff] %vm759_vm2, %v1157_v16  ;;  %v1155_v24 = vmul.f32 %v1712_v17, %v2187_v1  ;;  %1739 = vpow2.f32 %v1416_v9  ;;  %v475_v42 = vpop.f32.mrf.mxu0 }
 0x10d   : > { %v1716_v25 = vpop.eup %1715  ;;  %765 = vst.msk [vmem:[%s2228_s18 + $0x48] sm:$0xff] %vm759_vm2, %v732_v21  ;;  %v641_v60 = vadd.f32 1.0, %v1714_v23  ;;  %1741 = vpow2.f32 %v1365_v13  ;;  %v898_v36 = vpop.f32.mrf.mxu1  ;;  %v1370_v21 = vmul.f32 -1.442695, %v2318_v4  ;;  %v2341_v28 = vadd.f32 %v2126_v20, %v475_v42 }
 0x10e   : > { %v1718_v26 = vpop.eup %1717  ;;  %1438 = vst.msk [vmem:[%s2228_s18 + $0x58] sm:$0xff] %vm759_vm2, %v1155_v24  ;;  %v1064_v27 = vadd.f32 1.0, %v1716_v25  ;;  %1743 = vpow2.f32 %v1414_v53  ;;  %v1530_v41 = vpop.f32.mrf.mxu0  ;;  %v1419_v25 = vmul.f32 -1.442695, %v2322_v10 }
 0x10f   : > { %v1720_v0 = vpop.eup %1719  ;;  %1745 = vrcp.f32 %v641_v60  ;;  %v639_v29 = vadd.f32 1.0, %v1718_v26  ;;  %v1564_v6 = vpop.f32.mrf.mxu1  ;;  %v2336_v60 = vadd.f32 %v1561_v32, %v2126_v20 }
 0x110   : > { %v1722_v33 = vpop.eup %1721  ;;  %1747 = vrcp.f32 %v1064_v27  ;;  %v1062_v30 = vadd.f32 1.0, %v1720_v0  ;;  %v488_v16 = vpop.f32.mrf.mxu0  ;;  %v1368_v27 = vmul.f32 -1.442695, %v2325_v52 }
 0x111   : > { %v1724_v1 = vpop.eup %1723  ;;  %1749 = vrcp.f32 %v639_v29  ;;  %v642_v37 = vadd.f32 1.0, %v1722_v33  ;;  %v911_v23 = vpop.f32.mrf.mxu1  ;;  %v1417_v33 = vmul.f32 -1.442695, %v2328_v47 }
 0x112   : > { %v1726_v38 = vpop.eup %1725  ;;  %1751 = vrcp.f32 %v1062_v30  ;;  %v1065_v35 = vadd.f32 1.0, %v1724_v1  ;;  %v2346_v30 = vadd.f32 %v2126_v20, %v898_v36  ;;  %v1531_v32 = vpop.f32.mrf.mxu0 }
 0x113   : > { %v1728_v43 = vpop.eup %1727  ;;  %1753 = vrcp.f32 %v642_v37  ;;  %v640_v44 = vadd.f32 1.0, %v1726_v38  ;;  %v1371_v37 = vmul.f32 -1.442695, %v2332_v8  ;;  %v2353_v38 = vadd.f32 %v1530_v41, %v2126_v20 }
 0x114   : > { %v1730_v49 = vpop.eup %1729  ;;  %1755 = vrcp.f32 %v1065_v35  ;;  %v1063_v50 = vadd.f32 1.0, %v1728_v43  ;;  %v1420_v43 = vmul.f32 -1.442695, %v2336_v60 }
 0x115   : > { %v1732_v51 = vpop.eup %1731  ;;  %1757 = vrcp.f32 %v640_v44  ;;  %v645_v40 = vadd.f32 1.0, %v1730_v49  ;;  %v2360_v44 = vadd.f32 %v1564_v6, %v2126_v20  ;;  %v1369_v49 = vmul.f32 -1.442695, %v2341_v28 }
 0x116   : > { %v1734_v56 = vpop.eup %1733  ;;  %1759 = vrcp.f32 %v1063_v50  ;;  %v1068_v58 = vadd.f32 1.0, %v1732_v51  ;;  %v2367_v50 = vadd.f32 %v2126_v20, %v488_v16 }
 0x117   : > { %v1736_v63 = vpop.eup %1735  ;;  %1761 = vrcp.f32 %v645_v40  ;;  %v643_v2 = vadd.f32 1.0, %v1734_v56  ;;  %v1418_v40 = vmul.f32 -1.442695, %v2346_v30  ;;  %v2374_v56 = vadd.f32 %v2126_v20, %v911_v23 }
 0x118   : > { %v1738_v7 = vpop.eup %1737  ;;  %1763 = vrcp.f32 %v1068_v58  ;;  %v1066_v48 = vadd.f32 1.0, %v1736_v63  ;;  %v1374_v63 = vmul.f32 -1.442695, %v2353_v38 }
 0x119   : > { %v1740_v9 = vpop.eup %1739  ;;  %1765 = vrcp.f32 %v643_v2  ;;  %v646_v12 = vadd.f32 1.0, %v1738_v7  ;;  %v2381_v2 = vadd.f32 %v1531_v32, %v2126_v20 }
 0x11a   : > { %v1742_v13 = vpop.eup %1741  ;;  %1767 = vrcp.f32 %v1066_v48  ;;  %v1069_v14 = vadd.f32 1.0, %v1740_v9  ;;  %v1423_v48 = vmul.f32 -1.442695, %v2360_v44 }
 0x11b   : > { %v1744_v53 = vpop.eup %1743  ;;  %1769 = vrcp.f32 %v646_v12  ;;  %v644_v17 = vadd.f32 1.0, %v1742_v13  ;;  %v1372_v13 = vmul.f32 -1.442695, %v2367_v50 }
 0x11c   : > { %v1746_v24 = vpop.eup %1745  ;;  %1771 = vrcp.f32 %v1069_v14  ;;  %v1067_v18 = vadd.f32 1.0, %v1744_v53  ;;  %v1421_v53 = vmul.f32 -1.442695, %v2374_v56 }
 0x11d   : > { %v1748_v59 = vpop.eup %1747  ;;  %v737_v26 = vmul.f32 %v1746_v24, %v2194_v46  ;;  %1773 = vrcp.f32 %v644_v17  ;;  %v1375_v24 = vmul.f32 -1.442695, %v2381_v2 }
 0x11e   : > { %v1750_v0 = vpop.eup %1749  ;;  %v1160_v29 = vmul.f32 %v1748_v59, %v2197_v54  ;;  %1775 = vrcp.f32 %v1067_v18  ;;  %v1565_v54 = vpop.f32.mrf.mxu1 }
 0x11f   : > { %v1752_v1 = vpop.eup %1751  ;;  %770 = vst.msk [vmem:[%s2228_s18 + $0xa0] sm:$0xff] %vm759_vm2, %v737_v26  ;;  %v735_v46 = vmul.f32 %v1750_v0, %v2204_v57  ;;  %1777 = vpow2.f32 %v1370_v21  ;;  %v2388_v9 = vadd.f32 %v1565_v54, %v2126_v20 }
 0x120   : > { %v1754_v35 = vpop.eup %1753  ;;  %1443 = vst.msk [vmem:[%s2228_s18 + $0xb0] sm:$0xff] %vm759_vm2, %v1160_v29  ;;  %v1158_v42 = vmul.f32 %v1752_v1, %v2207_v62  ;;  %1779 = vpow2.f32 %v1419_v25 }
 0x121   : > { %v1756_v57 = vpop.eup %1755  ;;  %768 = vst.msk [vmem:[%s2228_s18 + $0x80] sm:$0xff] %vm759_vm2, %v735_v46  ;;  %v738_v36 = vmul.f32 %v1754_v35, %v2211_v5  ;;  %1781 = vpow2.f32 %v1368_v27  ;;  %v491_v5 = vpop.f32.mrf.mxu0  ;;  %v1424_v59 = vmul.f32 -1.442695, %v2388_v9 }
 0x122   : > { %v1758_v62 = vpop.eup %1757  ;;  %1441 = vst.msk [vmem:[%s2228_s18 + $0x90] sm:$0xff] %vm759_vm2, %v1158_v42  ;;  %v1161_v51 = vmul.f32 %v1756_v57, %v2215_v11  ;;  %1783 = vpow2.f32 %v1417_v33  ;;  %v914_v11 = vpop.f32.mrf.mxu1  ;;  %v2395_v14 = vadd.f32 %v2126_v20, %v491_v5 }
 0x123   : > { %v1760_v58 = vpop.eup %1759  ;;  %771 = vst.msk [vmem:[%s2228_s18 + $0xa8] sm:$0xff] %vm759_vm2, %v738_v36  ;;  %v736_v41 = vmul.f32 %v1758_v62, %v2220_v15  ;;  %1785 = vpow2.f32 %v1371_v37  ;;  %v2402_v17 = vadd.f32 %v2126_v20, %v914_v11 }
 0x124   : > { %v1762_v6 = vpop.eup %1761  ;;  %1444 = vst.msk [vmem:[%s2228_s18 + $0xb8] sm:$0xff] %vm759_vm2, %v1161_v51  ;;  %v1159_v7 = vmul.f32 %v1760_v58, %v2225_v19  ;;  %1787 = vpow2.f32 %v1420_v43  ;;  %v2410_v18 = vpop.f32.mrf.mxu1  ;;  %v1373_v27 = vmul.f32 -1.442695, %v2395_v14 }
 0x125   : > { %v1764_v15 = vpop.eup %1763  ;;  %769 = vst.msk [vmem:[%s2228_s18 + $0x88] sm:$0xff] %vm759_vm2, %v736_v41  ;;  %v741_v12 = vmul.f32 %v1762_v6, %v2235_v22  ;;  %1789 = vpow2.f32 %v1369_v49  ;;  %v2404_v22 = vpop.f32.mrf.mxu0 }
 0x126   : > { %v1766_v19 = vpop.eup %1765  ;;  %1442 = vst.msk [vmem:[%s2228_s18 + $0x98] sm:$0xff] %vm759_vm2, %v1159_v7  ;;  %v1164_v16 = vmul.f32 %v1764_v15, %v2242_v31  ;;  %1791 = vpow2.f32 %v1418_v40 }
 0x127   : > { %v1768_v21 = vpop.eup %1767  ;;  %774 = vst.msk [vmem:[%s2228_s18 + $0xe0] sm:$0xff] %vm759_vm2, %v741_v12  ;;  %v739_v23 = vmul.f32 %v1766_v19, %v2249_v34  ;;  %1793 = vpow2.f32 %v1374_v63  ;;  %v504_v33 = vpop.f32.mrf.mxu0 }
 0x128   : > { %v1770_v31 = vpop.eup %1769  ;;  %1447 = vst.msk [vmem:[%s2228_s18 + $0xf0] sm:$0xff] %vm759_vm2, %v1164_v16  ;;  %v1162_v25 = vmul.f32 %v1768_v21, %v2256_v39  ;;  %1795 = vpow2.f32 %v1423_v48  ;;  %v1422_v39 = vmul.f32 -1.442695, %v2402_v17  ;;  %v2436_v21 = vadd.f32 %v2404_v22, %v2126_v20 }
 0x129   : > { %v1772_v26 = vpop.eup %1771  ;;  %772 = vst.msk [vmem:[%s2228_s18 + $0xc0] sm:$0xff] %vm759_vm2, %v739_v23  ;;  %v742_v34 = vmul.f32 %v1770_v31, %v2263_v45  ;;  %1797 = vpow2.f32 %v1372_v13  ;;  %v927_v45 = vpop.f32.mrf.mxu1 }
 0x12a   : > { %v1774_v0 = vpop.eup %1773  ;;  %1445 = vst.msk [vmem:[%s2228_s18 + $0xd0] sm:$0xff] %vm759_vm2, %v1162_v25  ;;  %v1165_v29 = vmul.f32 %v1772_v26, %v2270_v55  ;;  %1799 = vpow2.f32 %v1421_v53  ;;  %v1535_v43 = vpop.f32.mrf.mxu0  ;;  %v2440_v25 = vadd.f32 %v2410_v18, %v2126_v20  ;;  %v2446_v22 = vadd.f32 %v2126_v20, %v927_v45 }
 0x12b   : > { %v1776_v32 = vpop.eup %1775  ;;  %775 = vst.msk [vmem:[%s2228_s18 + $0xe8] sm:$0xff] %vm759_vm2, %v742_v34  ;;  %v740_v1 = vmul.f32 %v1774_v0, %v2277_v61  ;;  %1801 = vpow2.f32 %v1375_v24  ;;  %v1569_v36 = vpop.f32.mrf.mxu1  ;;  %v2443_v34 = vadd.f32 %v2126_v20, %v504_v33  ;;  %v2450_v18 = vadd.f32 %v1535_v43, %v2126_v20 }
 0x12c   : > { %v1778_v46 = vpop.eup %1777  ;;  %1448 = vst.msk [vmem:[%s2228_s18 + $0xf8] sm:$0xff] %vm759_vm2, %v1165_v29  ;;  %v1163_v37 = vmul.f32 %v1776_v32, %v2284_v3  ;;  %1803 = vpow2.f32 %v1424_v59  ;;  %v507_v58 = vpop.f32.mrf.mxu0 }
 0x12d   : > { %v1780_v54 = vpop.eup %1779  ;;  %773 = vst.msk [vmem:[%s2228_s18 + $0xc8] sm:$0xff] %vm759_vm2, %v740_v1  ;;  %v649_v55 = vadd.f32 1.0, %v1778_v46  ;;  %1805 = vpow2.f32 %v1373_v27  ;;  %v930_v11 = vpop.f32.mrf.mxu1  ;;  %v1378_v1 = vmul.f32 -1.442695, %v2436_v21  ;;  %v2459_v43 = vadd.f32 %v2126_v20, %v507_v58 }
 0x12e   : > { %v1782_v35 = vpop.eup %1781  ;;  %1446 = vst.msk [vmem:[%s2228_s18 + $0xd8] sm:$0xff] %vm759_vm2, %v1163_v37  ;;  %v1072_v42 = vadd.f32 1.0, %v1780_v54  ;;  %1807 = vpow2.f32 %v1422_v39  ;;  %v1538_v19 = vpop.f32.mrf.mxu0  ;;  %v1427_v54 = vmul.f32 -1.442695, %v2440_v25 }
 0x12f   : > { %v1784_v61 = vpop.eup %1783  ;;  %1809 = vrcp.f32 %v649_v55  ;;  %v647_v57 = vadd.f32 1.0, %v1782_v35  ;;  %v1572_v23 = vpop.f32.mrf.mxu1  ;;  %v2454_v55 = vadd.f32 %v1569_v36, %v2126_v20 }
 0x130   : > { %v1786_v49 = vpop.eup %1785  ;;  %1811 = vrcp.f32 %v1072_v42  ;;  %v1070_v62 = vadd.f32 1.0, %v1784_v61  ;;  %v520_v29 = vpop.f32.mrf.mxu0  ;;  %v1376_v42 = vmul.f32 -1.442695, %v2443_v34 }
 0x131   : > { %v1788_v3 = vpop.eup %1787  ;;  %1813 = vrcp.f32 %v647_v57  ;;  %v650_v51 = vadd.f32 1.0, %v1786_v49  ;;  %v943_v46 = vpop.f32.mrf.mxu1  ;;  %v1425_v49 = vmul.f32 -1.442695, %v2446_v22 }
 0x132   : > { %v1790_v40 = vpop.eup %1789  ;;  %1815 = vrcp.f32 %v1070_v62  ;;  %v1073_v5 = vadd.f32 1.0, %v1788_v3  ;;  %v2464_v62 = vadd.f32 %v2126_v20, %v930_v11  ;;  %v1539_v36 = vpop.f32.mrf.mxu0 }
 0x133   : > { %v1792_v41 = vpop.eup %1791  ;;  %1817 = vrcp.f32 %v650_v51  ;;  %v648_v63 = vadd.f32 1.0, %v1790_v40  ;;  %v1379_v51 = vmul.f32 -1.442695, %v2450_v18  ;;  %v2471_v40 = vadd.f32 %v1538_v19, %v2126_v20 }
 0x134   : > { %v1794_v6 = vpop.eup %1793  ;;  %1819 = vrcp.f32 %v1073_v5  ;;  %v1071_v7 = vadd.f32 1.0, %v1792_v41  ;;  %v1428_v41 = vmul.f32 -1.442695, %v2454_v55 }
 0x135   : > { %v1796_v48 = vpop.eup %1795  ;;  %1821 = vrcp.f32 %v648_v63  ;;  %v653_v15 = vadd.f32 1.0, %v1794_v6  ;;  %v2478_v63 = vadd.f32 %v1572_v23, %v2126_v20  ;;  %v1377_v6 = vmul.f32 -1.442695, %v2459_v43 }
 0x136   : > { %v1798_v12 = vpop.eup %1797  ;;  %1823 = vrcp.f32 %v1071_v7  ;;  %v1076_v13 = vadd.f32 1.0, %v1796_v48  ;;  %v2485_v7 = vadd.f32 %v2126_v20, %v520_v29 }
 0x137   : > { %v1800_v16 = vpop.eup %1799  ;;  %1825 = vrcp.f32 %v653_v15  ;;  %v651_v53 = vadd.f32 1.0, %v1798_v12  ;;  %v1426_v15 = vmul.f32 -1.442695, %v2464_v62  ;;  %v2492_v12 = vadd.f32 %v2126_v20, %v943_v46 }
 0x138   : > { %v1802_v24 = vpop.eup %1801  ;;  %1827 = vrcp.f32 %v1076_v13  ;;  %v1074_v31 = vadd.f32 1.0, %v1800_v16  ;;  %v1382_v16 = vmul.f32 -1.442695, %v2471_v40 }
 0x139   : > { %v1804_v59 = vpop.eup %1803  ;;  %1829 = vrcp.f32 %v651_v53  ;;  %v654_v26 = vadd.f32 1.0, %v1802_v24  ;;  %v2499_v53 = vadd.f32 %v1539_v36, %v2126_v20 }
 0x13a   : > { %v1806_v27 = vpop.eup %1805  ;;  %1831 = vrcp.f32 %v1074_v31  ;;  %v1077_v0 = vadd.f32 1.0, %v1804_v59  ;;  %v1431_v31 = vmul.f32 -1.442695, %v2478_v63 }
 0x13b   : > { %v1808_v39 = vpop.eup %1807  ;;  %1833 = vrcp.f32 %v654_v26  ;;  %v652_v32 = vadd.f32 1.0, %v1806_v27  ;;  %v1380_v27 = vmul.f32 -1.442695, %v2485_v7  ;;  %v1383_v46 = vmul.f32 -1.442695, %v2499_v53 }
 0x13c   : > { %v1810_v37 = vpop.eup %1809  ;;  %1835 = vrcp.f32 %v1077_v0  ;;  %v1075_v33 = vadd.f32 1.0, %v1808_v39  ;;  %v1429_v39 = vmul.f32 -1.442695, %v2492_v12 }
 0x13d   : > { %v1812_v45 = vpop.eup %1811  ;;  %v745_v35 = vmul.f32 %v1810_v37, %v2318_v4  ;;  %1837 = vrcp.f32 %v652_v32 }
 0x13e   : > { %v1814_v61 = vpop.eup %1813  ;;  %v1168_v57 = vmul.f32 %v1812_v45, %v2322_v10  ;;  %1839 = vrcp.f32 %v1075_v33  ;;  %v1573_v10 = vpop.f32.mrf.mxu1 }
 0x13f   : > { %v1816_v3 = vpop.eup %1815  ;;  %778 = vst.msk [vmem:[%s2228_s18 + $0x120] sm:$0xff] %vm759_vm2, %v745_v35  ;;  %v743_v4 = vmul.f32 %v1814_v61, %v2325_v52  ;;  %1841 = vpow2.f32 %v1378_v1  ;;  %v2506_v59 = vadd.f32 %v1573_v10, %v2126_v20 }
 0x140   : > { %v1818_v5 = vpop.eup %1817  ;;  %1451 = vst.msk [vmem:[%s2228_s18 + $0x130] sm:$0xff] %vm759_vm2, %v1168_v57  ;;  %v1166_v58 = vmul.f32 %v1816_v3, %v2328_v47  ;;  %1843 = vpow2.f32 %v1427_v54 }
 0x141   : > { %v1820_v52 = vpop.eup %1819  ;;  %776 = vst.msk [vmem:[%s2228_s18 + $0x100] sm:$0xff] %vm759_vm2, %v743_v4  ;;  %v746_v11 = vmul.f32 %v1818_v5, %v2332_v8  ;;  %1845 = vpow2.f32 %v1376_v42  ;;  %v523_v8 = vpop.f32.mrf.mxu0  ;;  %v1432_v33 = vmul.f32 -1.442695, %v2506_v59 }
 0x142   : > { %v1822_v47 = vpop.eup %1821  ;;  %1449 = vst.msk [vmem:[%s2228_s18 + $0x110] sm:$0xff] %vm759_vm2, %v1166_v58  ;;  %v1169_v48 = vmul.f32 %v1820_v52, %v2336_v60  ;;  %1847 = vpow2.f32 %v1425_v49  ;;  %v946_v60 = vpop.f32.mrf.mxu1  ;;  %v2513_v0 = vadd.f32 %v2126_v20, %v523_v8 }
 0x143   : > { %v1824_v13 = vpop.eup %1823  ;;  %779 = vst.msk [vmem:[%s2228_s18 + $0x128] sm:$0xff] %vm759_vm2, %v746_v11  ;;  %v744_v19 = vmul.f32 %v1822_v47, %v2341_v28  ;;  %1849 = vpow2.f32 %v1379_v51 }
 0x144   : > { %v1826_v23 = vpop.eup %1825  ;;  %1452 = vst.msk [vmem:[%s2228_s18 + $0x138] sm:$0xff] %vm759_vm2, %v1169_v48  ;;  %v1167_v24 = vmul.f32 %v1824_v13, %v2346_v30  ;;  %1851 = vpow2.f32 %v1428_v41 }
 0x145   : > { %v1828_v28 = vpop.eup %1827  ;;  %777 = vst.msk [vmem:[%s2228_s18 + $0x108] sm:$0xff] %vm759_vm2, %v744_v19  ;;  %v749_v26 = vmul.f32 %v1826_v23, %v2353_v38  ;;  %1853 = vpow2.f32 %v1377_v6  ;;  %v1905_v38 = vld [vmem:[%s2656_s2] ss:$0 sm:$0xff] }
 0x146   : > { %v1830_v30 = vpop.eup %1829  ;;  %1450 = vst.msk [vmem:[%s2228_s18 + $0x118] sm:$0xff] %vm759_vm2, %v1167_v24  ;;  %v1172_v29 = vmul.f32 %v1828_v28, %v2360_v44  ;;  %1855 = vpow2.f32 %v1426_v15  ;;  %v2522_v32 = vadd.f32 %v1905_v38, %v946_v60 }
 0x147   : > { %v1832_v1 = vpop.eup %1831  ;;  %782 = vst.msk [vmem:[%s2228_s18 + $0x160] sm:$0xff] %vm759_vm2, %v749_v26  ;;  %v747_v20 = vmul.f32 %v1830_v30, %v2367_v50  ;;  %1857 = vpow2.f32 %v1382_v16  ;;  %v1381_v50 = vmul.f32 -1.442695, %v2513_v0 }
 0x148   : > { %v1834_v44 = vpop.eup %1833  ;;  %1455 = vst.msk [vmem:[%s2228_s18 + $0x170] sm:$0xff] %vm759_vm2, %v1172_v29  ;;  %v1170_v37 = vmul.f32 %v1832_v1, %v2374_v56  ;;  %1859 = vpow2.f32 %v1431_v31  ;;  %v1430_v56 = vmul.f32 -1.442695, %v2522_v32 }
 0x149   : > { %v1836_v54 = vpop.eup %1835  ;;  %780 = vst.msk [vmem:[%s2228_s18 + $0x140] sm:$0xff] %vm759_vm2, %v747_v20  ;;  %v750_v45 = vmul.f32 %v1834_v44, %v2381_v2  ;;  %1861 = vpow2.f32 %v1380_v27 }
 0x14a   : > { %v1838_v35 = vpop.eup %1837  ;;  %1453 = vst.msk [vmem:[%s2228_s18 + $0x150] sm:$0xff] %vm759_vm2, %v1170_v37  ;;  %v1173_v42 = vmul.f32 %v1836_v54, %v2388_v9  ;;  %1863 = vpow2.f32 %v1429_v39 }
 0x14b   : > { %v1840_v61 = vpop.eup %1839  ;;  %783 = vst.msk [vmem:[%s2228_s18 + $0x168] sm:$0xff] %vm759_vm2, %v750_v45  ;;  %v748_v57 = vmul.f32 %v1838_v35, %v2395_v14  ;;  %1865 = vpow2.f32 %v1383_v46 }
 0x14c   : > { %v1842_v2 = vpop.eup %1841  ;;  %1456 = vst.msk [vmem:[%s2228_s18 + $0x178] sm:$0xff] %vm759_vm2, %v1173_v42  ;;  %v1171_v49 = vmul.f32 %v1840_v61, %v2402_v17  ;;  %1867 = vpow2.f32 %v1432_v33 }
 0x14d   : > { %v1844_v36 = vpop.eup %1843  ;;  %781 = vst.msk [vmem:[%s2228_s18 + $0x148] sm:$0xff] %vm759_vm2, %v748_v57  ;;  %v657_v9 = vadd.f32 1.0, %v1842_v2  ;;  %1869 = vpow2.f32 %v1381_v50 }
 0x14e   : > { %v1846_v3 = vpop.eup %1845  ;;  %1454 = vst.msk [vmem:[%s2228_s18 + $0x158] sm:$0xff] %vm759_vm2, %v1171_v49  ;;  %v1080_v4 = vadd.f32 1.0, %v1844_v36  ;;  %1871 = vpow2.f32 %v1430_v56 }
 0x14f   : > { %v1848_v51 = vpop.eup %1847  ;;  %1873 = vrcp.f32 %v657_v9  ;;  %v655_v14 = vadd.f32 1.0, %v1846_v3 }
 0x150   : > { %v1850_v10 = vpop.eup %1849  ;;  %1875 = vrcp.f32 %v1080_v4  ;;  %v1078_v5 = vadd.f32 1.0, %v1848_v51 }
 0x151   : > { %v1852_v58 = vpop.eup %1851  ;;  %1877 = vrcp.f32 %v655_v14  ;;  %v658_v17 = vadd.f32 1.0, %v1850_v10 }
 0x152   : > { %v1854_v41 = vpop.eup %1853  ;;  %1879 = vrcp.f32 %v1078_v5  ;;  %v1081_v52 = vadd.f32 1.0, %v1852_v58 }
 0x153   : > { %v1856_v11 = vpop.eup %1855  ;;  %1881 = vrcp.f32 %v658_v17  ;;  %v656_v6 = vadd.f32 1.0, %v1854_v41 }
 0x154   : > { %v1858_v47 = vpop.eup %1857  ;;  %1883 = vrcp.f32 %v1081_v52  ;;  %v1079_v48 = vadd.f32 1.0, %v1856_v11 }
 0x155   : > { %v1860_v15 = vpop.eup %1859  ;;  %1885 = vrcp.f32 %v656_v6  ;;  %v661_v8 = vadd.f32 1.0, %v1858_v47 }
 0x156   : > { %v1862_v13 = vpop.eup %1861  ;;  %1887 = vrcp.f32 %v1079_v48  ;;  %v1084_v19 = vadd.f32 1.0, %v1860_v15 }
 0x157   : > { %v1864_v16 = vpop.eup %1863  ;;  %1889 = vrcp.f32 %v661_v8  ;;  %v659_v60 = vadd.f32 1.0, %v1862_v13 }
 0x158   : > { %v1866_v23 = vpop.eup %1865  ;;  %1891 = vrcp.f32 %v1084_v19  ;;  %v1082_v24 = vadd.f32 1.0, %v1864_v16 }
 0x159   : > { %v1868_v31 = vpop.eup %1867  ;;  %1893 = vrcp.f32 %v659_v60  ;;  %v662_v28 = vadd.f32 1.0, %v1866_v23 }
 0x15a   : > { %v1870_v26 = vpop.eup %1869  ;;  %1895 = vrcp.f32 %v1082_v24  ;;  %v1085_v27 = vadd.f32 1.0, %v1868_v31 }
 0x15b   : > { %v1872_v30 = vpop.eup %1871  ;;  %1897 = vrcp.f32 %v662_v28  ;;  %v660_v29 = vadd.f32 1.0, %v1870_v26 }
 0x15c   : > { %v1874_v39 = vpop.eup %1873  ;;  %1899 = vrcp.f32 %v1085_v27  ;;  %v1083_v38 = vadd.f32 1.0, %v1872_v30 }
 0x15d   : > { %v1876_v1 = vpop.eup %1875  ;;  %v753_v20 = vmul.f32 %v1874_v39, %v2436_v21  ;;  %1901 = vrcp.f32 %v660_v29 }
 0x15e   : > { %v1878_v46 = vpop.eup %1877  ;;  %v1176_v44 = vmul.f32 %v1876_v1, %v2440_v25  ;;  %1903 = vrcp.f32 %v1083_v38 }
 0x15f   : > { %v1880_v37 = vpop.eup %1879  ;;  %786 = vst.msk [vmem:[%s2228_s18 + $0x1a0] sm:$0xff] %vm759_vm2, %v753_v20  ;;  %v751_v33 = vmul.f32 %v1878_v46, %v2443_v34 }
 0x160   : > { %v1882_v54 = vpop.eup %1881  ;;  %1459 = vst.msk [vmem:[%s2228_s18 + $0x1b0] sm:$0xff] %vm759_vm2, %v1176_v44  ;;  %v1174_v45 = vmul.f32 %v1880_v37, %v2446_v22 }
 0x161   : > { %v1884_v50 = vpop.eup %1883  ;;  %784 = vst.msk [vmem:[%s2228_s18 + $0x180] sm:$0xff] %vm759_vm2, %v751_v33  ;;  %v754_v21 = vmul.f32 %v1882_v54, %v2450_v18 }
 0x162   : > { %v1886_v25 = vpop.eup %1885  ;;  %1457 = vst.msk [vmem:[%s2228_s18 + $0x190] sm:$0xff] %vm759_vm2, %v1174_v45  ;;  %v1177_v35 = vmul.f32 %v1884_v50, %v2454_v55 }
 0x163   : > { %v1888_v42 = vpop.eup %1887  ;;  %787 = vst.msk [vmem:[%s2228_s18 + $0x1a8] sm:$0xff] %vm759_vm2, %v754_v21  ;;  %v752_v34 = vmul.f32 %v1886_v25, %v2459_v43 }
 0x164   : > { %v1890_v22 = vpop.eup %1889  ;;  %1460 = vst.msk [vmem:[%s2228_s18 + $0x1b8] sm:$0xff] %vm759_vm2, %v1177_v35  ;;  %v1175_v56 = vmul.f32 %v1888_v42, %v2464_v62 }
 0x165   : > { %v1892_v18 = vpop.eup %1891  ;;  %785 = vst.msk [vmem:[%s2228_s18 + $0x188] sm:$0xff] %vm759_vm2, %v752_v34  ;;  %v757_v61 = vmul.f32 %v1890_v22, %v2471_v40 }
 0x166   : > { %v1894_v55 = vpop.eup %1893  ;;  %1458 = vst.msk [vmem:[%s2228_s18 + $0x198] sm:$0xff] %vm759_vm2, %v1175_v56  ;;  %v1180_v57 = vmul.f32 %v1892_v18, %v2478_v63 }
 0x167   : > { %v1896_v43 = vpop.eup %1895  ;;  %790 = vst.msk [vmem:[%s2228_s18 + $0x1e0] sm:$0xff] %vm759_vm2, %v757_v61  ;;  %v755_v2 = vmul.f32 %v1894_v55, %v2485_v7 }
 0x168   : > { %v1898_v49 = vpop.eup %1897  ;;  %1463 = vst.msk [vmem:[%s2228_s18 + $0x1f0] sm:$0xff] %vm759_vm2, %v1180_v57  ;;  %v1178_v62 = vmul.f32 %v1896_v43, %v2492_v12 }
 0x169   : > { %v1900_v40 = vpop.eup %1899  ;;  %788 = vst.msk [vmem:[%s2228_s18 + $0x1c0] sm:$0xff] %vm759_vm2, %v755_v2  ;;  %v758_v63 = vmul.f32 %v1898_v49, %v2499_v53 }
 0x16a   : > { %v1902_v36 = vpop.eup %1901  ;;  %1461 = vst.msk [vmem:[%s2228_s18 + $0x1d0] sm:$0xff] %vm759_vm2, %v1178_v62  ;;  %v1181_v7 = vmul.f32 %v1900_v40, %v2506_v59 }
 0x16b   : > { %v1904_v9 = vpop.eup %1903  ;;  %791 = vst.msk [vmem:[%s2228_s18 + $0x1e8] sm:$0xff] %vm759_vm2, %v758_v63  ;;  %v756_v12 = vmul.f32 %v1902_v36, %v2513_v0 }
 0x16c   : > { %1464 = vst.msk [vmem:[%s2228_s18 + $0x1f8] sm:$0xff] %vm759_vm2, %v1181_v7  ;;  %v1179_v53 = vmul.f32 %v1904_v9, %v2522_v32 }
 0x16d   : > { %789 = vst.msk [vmem:[%s2228_s18 + $0x1c8] sm:$0xff] %vm759_vm2, %v756_v12 }
 0x16e   : > { %1462 = vst.msk [vmem:[%s2228_s18 + $0x1d8] sm:$0xff] %vm759_vm2, %v1179_v53 }
 0x16f   : > { %1919 = shalt.err (!%p1916_p5)
}
 0x170   : > { %s1920_s7 = scalar_lea.hbm %s2596_s28, 8192  ;;  %s1924_s10 = scalar_lea.hbm %s2657_s3, 16384 }
 0x171   : > { %p1921_p6 = scmp.ne.s32.totalorder %s2596_s28, %s1920_s7  ;;  %p1925_p10 = scmp.lt.s32.totalorder %s2596_s28, %s2657_s3 }
 0x172   : > { %p1926_p11 = scmp.lt.s32.totalorder %s1924_s10, %s1920_s7 }
 0x173   : > { %p1922_p7 = pnand %p1921_p6, %p2047_p4 }
 0x174   : > { %p1927_p12 = por %p1926_p11, %p1925_p10 }
 0x175   : > { %p1923_p9 = pneg %p1922_p7 }
 0x177   : > { %p1928_p13 = pnand %p1927_p12, %p1923_p9 }
 0x179   : > { %1931 = shalt.err (!%p1928_p13)
}
 0x17a   : > { %s1985_s19 = smov 128   ;;  %s1986_s21 = smov 8  }
 0x17b   : > { %1576 = dma.vmem_to_hbm [thread:$0]  (%p2047_p4), %s2598_s26, 8192, %s2596_s28, %s2609_s29, %s1985_s19, %s1985_s19, %s1986_s21  }
 0x17c PF: > { %p1582_p0 = scmp.ge.s32.totalorder %s1982_s17, 2  ;;  %s1247_s23 = sand.u32 1, %s1962_s12  }
 0x17d   : > { %s1248_s15 = scalar_lea.sflag [#allocation3], %s1247_s23 }
 0x17e   : > { %p1579_p1 = pnand %p1582_p0, %p2054_p8 }
 0x180   : > { %p1580_p2 = pneg %p1579_p1 }
 0x182   : > { %1957 = dma.done.wait (%p1580_p2), %s1248_s15, 8192  }
 0x183   : > { %1959 = vsyncadd (%p1580_p2), %s1248_s15, 4294959104  ;;  %s16_s17 = sadd.s32 1, %s1982_s17   ;;  %s2660_s12 = smov %s1966_s13 }
 0x184   : > { %p13_p3 = scmp.ge.s32.totalorder %s16_s17, 4   ;;  %s2661_s13 = smov %s1970_s14 }
 0x185   : > { %s2662_s14 = smov %s2060_s25  ;;  %s2663_s15 = smov %s1978_s16 }
 0x186   : > { %s2664_s16 = smov %s2666_s20  ;;  %15 = sbr.rel (!%p13_p3) target bundleno = 4 (0x4), region = 69 }
 0x18b   :  { %1253 = vsyncpa [#allocation3], 1 }
 0x18c   :  { %1255 = vsyncpa [#allocation3 + $0x1], 1 }

</bundles_post_ra>
